<compile_context>
chip_gen: v6e
topology: v6e:2x2x1
jax: 0.10.0
libtpu: 0.0.40
codegen_flags: <defaults>
</compile_context>

<pallas_src>
import functools

import jax
import jax.numpy as jnp
from jax.experimental import pallas as pl
from jax.experimental.pallas import tpu as pltpu


def _sdpa_kernel(*refs, inv_temperature, has_mask):
    if has_mask:
        q_ref, k_ref, v_ref, mask_ref, out_ref, attn_ref = refs
    else:
        q_ref, k_ref, v_ref, out_ref, attn_ref = refs
        mask_ref = None

    # Fold 1/temperature into the small (BB, TQ, D) q tile, then drop q/k to
    # bf16 for the MXU (f32 matmuls lower to multi-pass bf16 on all TPU gens).
    q = (q_ref[...] * inv_temperature).astype(jnp.bfloat16)    # (BB, TQ, D)
    k = k_ref[...].astype(jnp.bfloat16)                         # (BB, Lk, D)

    # s = (q / temperature) @ k^T, batched over BB. Contracting the last dim of
    # both operands is the MXU's native transposed-RHS form (no k transpose).
    s = jnp.einsum("bqd,bkd->bqk", q, k,
                   preferred_element_type=jnp.float32)          # (BB, TQ, Lk) f32

    if has_mask:
        # masked_fill(mask, -1e10); mask arrives as int8 (1 -> masked).
        s = jnp.where(mask_ref[...] != 0, jnp.float32(-10000000000.0), s)

    # Softmax over the last (Lk) axis. Reductions kept in f32 on all chips.
    m = jnp.max(s, axis=-1, keepdims=True)
    p = jnp.exp(s - m)                                          # (BB, TQ, Lk) f32
    denom = jnp.sum(p, axis=-1, keepdims=True)                  # (BB, TQ, 1)
    inv = 1.0 / denom          # exact: returned attn rows sum to 1 (tiny tensor)

    # Store attn first so the normalized f32 tile dies immediately (reduces the
    # number of live (TQ, Lk) tiles -> less spill pressure, esp. on v5e).
    attn_ref[...] = (p * inv).astype(attn_ref.dtype)

    # TODO(synk): dropout is identity here (inference / eval mode); training-time
    # dropout would need pltpu.prng_seed + pltpu.prng_random_bits for a Bernoulli mask.

    # P @ V on the *unnormalized* p in bf16 with f32 accumulation; the small
    # (BB, TQ, Dv) result is normalized afterwards.
    out = jnp.einsum("bqk,bkd->bqd", p.astype(jnp.bfloat16),
                     v_ref[...].astype(jnp.bfloat16),
                     preferred_element_type=jnp.float32)
    out_ref[...] = (out * inv).astype(out_ref.dtype)


def _step_vmem_bytes(bb, tq, Lk, D, Dv, in_bytes, attn_bytes, out_bytes, has_mask):
    """Approximate VMEM bytes for one grid step (double-buffered blocks + temps)."""
    blocks = bb * (tq * D + Lk * D) * in_bytes        # q, k blocks
    blocks += bb * Lk * Dv * in_bytes                 # v block
    blocks += bb * tq * Dv * out_bytes                # out block
    blocks += bb * tq * Lk * attn_bytes               # attn block
    if has_mask:
        blocks += bb * tq * Lk                        # int8 mask block
    temps = 3 * bb * tq * Lk * 4                      # live f32 (TQ, Lk) intermediates
    return 2 * blocks + temps                         # x2: pipeline double-buffering


def _choose_tiling(B, Lq, Lk, D, Dv, in_bytes, attn_bytes, out_bytes,
                   has_mask, block_q, budget):
    # q tile: full Lq when small, otherwise block_q; shrink if one step would
    # not fit the VMEM budget (long Lk / small-VMEM chip).
    tq = Lq if Lq <= block_q else block_q
    while tq > 8 and _step_vmem_bytes(1, tq, Lk, D, Dv, in_bytes, attn_bytes,
                                      out_bytes, has_mask) > budget:
        tq = max(8, (tq // 2) // 8 * 8)
    # TODO(synk): for very long Lk the score row is untiled; an online-softmax
    # loop over Lk blocks would be needed to stay resident beyond ~16K context.

    # Fold batches into one grid step while it stays cheap: amortizes the
    # ~0.35us/step overhead and tiny DMAs for TGAT-style small shapes. Cap so
    # the batch grid axis keeps >= 2 steps (v7x megacore split lands on B).
    bb = 1
    bb_cap = max(1, B // 2) if B > 1 else 1
    while (bb * 2 <= bb_cap and bb * 2 * tq <= 512 and
           _step_vmem_bytes(bb * 2, tq, Lk, D, Dv, in_bytes, attn_bytes,
                            out_bytes, has_mask) <= budget):
        bb *= 2
    return bb, tq


def scaled_dot_product_attention(q, k, v, temperature, mask=None, *,
                                 block_q=256, attn_dtype=None):
    """Pallas equivalent of ScaledDotProductAttention.forward (eval mode).

    q: (B, Lq, D)  k: (B, Lk, D)  v: (B, Lk, Dv)
    mask: optional bool/int (B, Lq, Lk), True -> position is masked out.
    attn_dtype: dtype of the returned attention matrix (default q.dtype; pass
      jnp.bfloat16 to halve the dominant HBM write stream for large Lk).
    Returns (output (B, Lq, Dv) in q.dtype, attn (B, Lq, Lk) in attn_dtype).
    """
    B, Lq, D = q.shape
    _, Lk, _ = k.shape
    Dv = v.shape[-1]

    has_mask = mask is not None
    attn_dtype = q.dtype if attn_dtype is None else jnp.dtype(attn_dtype)

    in_bytes = jnp.dtype(q.dtype).itemsize
    attn_bytes = jnp.dtype(attn_dtype).itemsize
    out_bytes = jnp.dtype(q.dtype).itemsize

    # Chip-aware VMEM limit: ~75% of physical VMEM (96 MiB on v5e/v6e 128 MiB,
    # 48 MiB on v7x 64 MiB), with a safe fallback if the query is unavailable.
    try:
        vmem_cap = int(pltpu.get_tpu_info().vmem_capacity_bytes)
    except Exception:
        vmem_cap = 64 * 1024 * 1024
    vmem_limit = (min(vmem_cap, 128 * 1024 * 1024) * 3) // 4
    budget = (vmem_limit * 4) // 5   # leave headroom for compiler temporaries

    bb, tq = _choose_tiling(B, Lq, Lk, D, Dv, in_bytes, attn_bytes, out_bytes,
                            has_mask, block_q, budget)
    grid = (pl.cdiv(B, bb), pl.cdiv(Lq, tq))   # B outermost: megacore splits on batch

    kernel = functools.partial(
        _sdpa_kernel,
        inv_temperature=1.0 / float(temperature),
        has_mask=has_mask)

    in_specs = [
        pl.BlockSpec((bb, tq, D), lambda b, i: (b, i, 0)),
        pl.BlockSpec((bb, Lk, D), lambda b, i: (b, 0, 0)),    # K: invariant over i -> no re-DMA
        pl.BlockSpec((bb, Lk, Dv), lambda b, i: (b, 0, 0)),   # V: invariant over i -> no re-DMA
    ]
    args = [q, k, v]
    if has_mask:
        in_specs.append(pl.BlockSpec((bb, tq, Lk), lambda b, i: (b, i, 0)))
        args.append(mask.astype(jnp.int8))   # 4x less mask DMA than int32

    out_specs = [
        pl.BlockSpec((bb, tq, Dv), lambda b, i: (b, i, 0)),
        pl.BlockSpec((bb, tq, Lk), lambda b, i: (b, i, 0)),
    ]
    out_shapes = (
        jax.ShapeDtypeStruct((B, Lq, Dv), q.dtype),
        jax.ShapeDtypeStruct((B, Lq, Lk), attn_dtype),
    )
    # TODO(synk): when Lk < 128, a lane-dense (B, Lq*Lk) attn slab (wrapper-side
    # reshape) would avoid masked partial stores; skipped to keep lowering simple.

    grid_spec = pltpu.PrefetchScalarGridSpec(
        num_scalar_prefetch=0,
        grid=grid,
        in_specs=in_specs,
        out_specs=out_specs,
    )

    return pl.pallas_call(
        kernel,
        out_shape=out_shapes,
        grid_spec=grid_spec,
        compiler_params=pltpu.CompilerParams(
            dimension_semantics=("parallel", "parallel"),
            vmem_limit_bytes=int(vmem_limit),
        ),
    )(*args)


def _reference(q, k, v, temperature, mask=None):
    attn = jnp.einsum("bqd,bkd->bqk", q, k) / temperature
    if mask is not None:
        attn = jnp.where(mask, -10000000000.0, attn)
    attn = jax.nn.softmax(attn, axis=2)
    out = jnp.einsum("bqk,bkd->bqd", attn, v)
    return out, attn


if __name__ == "__main__":
    key = jax.random.PRNGKey(0)

    # ---- Case 1: TGAT-like small shapes, with a mask ----
    B, Lq, Lk, D = 2, 8, 8, 32
    temperature = float(D) ** 0.5

    kq, kk, kv, km = jax.random.split(key, 4)
    q = jax.random.normal(kq, (B, Lq, D), dtype=jnp.float32)
    k = jax.random.normal(kk, (B, Lk, D), dtype=jnp.float32)
    v = jax.random.normal(kv, (B, Lk, D), dtype=jnp.float32)
    mask = jax.random.bernoulli(km, p=0.2, shape=(B, Lq, Lk))

    out, attn = scaled_dot_product_attention(q, k, v, temperature, mask=mask)
    jax.block_until_ready((out, attn))
    out_ref, attn_ref = _reference(q, k, v, temperature, mask=mask)
    # bf16 MXU operands -> slightly loosened tolerances.
    assert jnp.allclose(out, out_ref, atol=2e-2, rtol=2e-2)
    assert jnp.allclose(attn, attn_ref, atol=2e-2, rtol=2e-2)
    assert jnp.allclose(jnp.sum(attn, axis=-1), 1.0, atol=1e-3)

    # ---- Case 2: mask=None path (mask DMA / select eliminated entirely) ----
    out2, attn2 = scaled_dot_product_attention(q, k, v, temperature, mask=None)
    jax.block_until_ready((out2, attn2))
    out2_ref, attn2_ref = _reference(q, k, v, temperature, mask=None)
    assert jnp.allclose(out2, out2_ref, atol=2e-2, rtol=2e-2)
    assert jnp.allclose(attn2, attn2_ref, atol=2e-2, rtol=2e-2)

    # ---- Case 3: batch folding + multiple q tiles + partial blocks on both axes ----
    B3, Lq3, Lk3, D3 = 5, 24, 16, 32
    temp3 = float(D3) ** 0.5
    k1, k2, k3, k4 = jax.random.split(jax.random.PRNGKey(1), 4)
    q3 = jax.random.normal(k1, (B3, Lq3, D3), dtype=jnp.float32)
    k3_ = jax.random.normal(k2, (B3, Lk3, D3), dtype=jnp.float32)
    v3 = jax.random.normal(k3, (B3, Lk3, D3), dtype=jnp.float32)
    mask3 = jax.random.bernoulli(k4, p=0.2, shape=(B3, Lq3, Lk3))
    # block_q=16 -> tq=16 (2 q tiles, last one partial); bb=2 -> 3 batch blocks,
    # last one partial. Exercises the cdiv-grid boundary behavior.
    out3, attn3 = scaled_dot_product_attention(q3, k3_, v3, temp3, mask=mask3,
                                               block_q=16)
    jax.block_until_ready((out3, attn3))
    out3_ref, attn3_ref = _reference(q3, k3_, v3, temp3, mask=mask3)
    assert jnp.allclose(out3, out3_ref, atol=2e-2, rtol=2e-2)
    assert jnp.allclose(attn3, attn3_ref, atol=2e-2, rtol=2e-2)

    # ---- Case 4: bf16 attn writeback option (halves the dominant HBM stream) ----
    out4, attn4 = scaled_dot_product_attention(q, k, v, temperature, mask=mask,
                                               attn_dtype=jnp.bfloat16)
    jax.block_until_ready((out4, attn4))
    assert attn4.dtype == jnp.bfloat16
    assert jnp.allclose(out4, out_ref, atol=2e-2, rtol=2e-2)
    assert jnp.allclose(attn4.astype(jnp.float32), attn_ref, atol=4e-2, rtol=4e-2)

    print("KERNEL_OK")
</pallas_src>

<mosaic_0001>
module attributes {stable_mosaic.version = 11 : i64} {
  func.func @_sdpa_kernel(%arg0: i32, %arg1: i32, %arg2: memref<1x8x32xf32, #tpu.memory_space<vmem>>, %arg3: memref<1x8x32xf32, #tpu.memory_space<vmem>>, %arg4: memref<1x8x32xf32, #tpu.memory_space<vmem>>, %arg5: memref<1x8x8xi8, #tpu.memory_space<vmem>>, %arg6: memref<1x8x32xf32, #tpu.memory_space<vmem>>, %arg7: memref<1x8x8xf32, #tpu.memory_space<vmem>>) attributes {dimension_semantics = [#tpu.dimension_semantics<parallel>, #tpu.dimension_semantics<parallel>], iteration_bounds = array<i64: 2, 1>, scalar_prefetch = 0 : i64, scratch_operands = 0 : i64, tpu.core_type = #tpu.core_type<tc>, window_params = [{transform_indices = @transform_0, window_bounds = array<i64: 1, 8, 32>}, {transform_indices = @transform_1, window_bounds = array<i64: 1, 8, 32>}, {transform_indices = @transform_2, window_bounds = array<i64: 1, 8, 32>}, {transform_indices = @transform_3, window_bounds = array<i64: 1, 8, 8>}, {transform_indices = @transform_4, window_bounds = array<i64: 1, 8, 32>}, {transform_indices = @transform_5, window_bounds = array<i64: 1, 8, 8>}]} {
    %c0 = arith.constant 0 : index
    %c0_0 = arith.constant 0 : index
    %c0_1 = arith.constant 0 : index
    %0 = vector.load %arg2[%c0, %c0_0, %c0_1] : memref<1x8x32xf32, #tpu.memory_space<vmem>>, vector<1x8x32xf32>
    %cst = arith.constant 0.176776692 : f32
    %1 = vector.broadcast %cst : f32 to vector<1x8x32xf32>
    %2 = arith.mulf %0, %1 : vector<1x8x32xf32>
    %3 = arith.truncf %2 : vector<1x8x32xf32> to vector<1x8x32xbf16>
    %c0_2 = arith.constant 0 : index
    %c0_3 = arith.constant 0 : index
    %c0_4 = arith.constant 0 : index
    %4 = vector.load %arg3[%c0_2, %c0_3, %c0_4] : memref<1x8x32xf32, #tpu.memory_space<vmem>>, vector<1x8x32xf32>
    %5 = arith.truncf %4 : vector<1x8x32xf32> to vector<1x8x32xbf16>
    "tpu.trace_start"() <{level = 10 : i32, message = "bqd,bkd->bqk"}> : () -> ()
    %cst_5 = arith.constant dense<0.000000e+00> : vector<1x8x8xf32>
    %6 = tpu.matmul %3, %5, %cst_5 {dimension_numbers = #tpu.dot_dimension_numbers<[2], [2], [1], [1], [0, 0, 0, 1, 1, 1], [0], [0]>} : vector<1x8x32xbf16>, vector<1x8x32xbf16>, vector<1x8x8xf32> -> vector<1x8x8xf32>
    "tpu.trace_stop"() : () -> ()
    %c0_6 = arith.constant 0 : index
    %c0_7 = arith.constant 0 : index
    %c0_8 = arith.constant 0 : index
    %7 = vector.load %arg5[%c0_6, %c0_7, %c0_8] : memref<1x8x8xi8, #tpu.memory_space<vmem>>, vector<1x8x8xi8>
    %c0_i8 = arith.constant 0 : i8
    %8 = vector.broadcast %c0_i8 : i8 to vector<1x8x8xi8>
    %9 = arith.cmpi ne, %7, %8 : vector<1x8x8xi8>
    %cst_9 = arith.constant -1.000000e+10 : f32
    %10 = vector.broadcast %cst_9 : f32 to vector<1x8x8xf32>
    %11 = arith.select %9, %10, %6 : vector<1x8x8xi1>, vector<1x8x8xf32>
    %cst_10 = arith.constant dense<0xFF800000> : vector<1x8xf32>
    %12 = vector.multi_reduction <maximumf>, %11, %cst_10 [2] : vector<1x8x8xf32> to vector<1x8xf32>
    %13 = vector.shape_cast %12 : vector<1x8xf32> to vector<1x8x1xf32>
    %14 = vector.broadcast %13 : vector<1x8x1xf32> to vector<1x8x8xf32>
    %15 = arith.subf %11, %14 : vector<1x8x8xf32>
    %16 = math.exp %15 : vector<1x8x8xf32>
    %cst_11 = arith.constant dense<0.000000e+00> : vector<1x8xf32>
    %17 = vector.multi_reduction <add>, %16, %cst_11 [2] : vector<1x8x8xf32> to vector<1x8xf32>
    %18 = vector.shape_cast %17 : vector<1x8xf32> to vector<1x8x1xf32>
    %cst_12 = arith.constant 1.000000e+00 : f32
    %19 = vector.broadcast %cst_12 : f32 to vector<1x8x1xf32>
    %20 = arith.divf %19, %18 : vector<1x8x1xf32>
    %21 = vector.broadcast %20 : vector<1x8x1xf32> to vector<1x8x8xf32>
    %22 = arith.mulf %16, %21 : vector<1x8x8xf32>
    %c0_13 = arith.constant 0 : index
    %c0_14 = arith.constant 0 : index
    %c0_15 = arith.constant 0 : index
    %23 = vector.load %arg7[%c0_13, %c0_14, %c0_15] : memref<1x8x8xf32, #tpu.memory_space<vmem>>, vector<1x8x8xf32>
    tpu.vector_store %arg7[%c0_13, %c0_14, %c0_15], %22 {strides = array<i32>} : memref<1x8x8xf32, #tpu.memory_space<vmem>>, vector<1x8x8xf32>,
    %24 = arith.truncf %16 : vector<1x8x8xf32> to vector<1x8x8xbf16>
    %c0_16 = arith.constant 0 : index
    %c0_17 = arith.constant 0 : index
    %c0_18 = arith.constant 0 : index
    %25 = vector.load %arg4[%c0_16, %c0_17, %c0_18] : memref<1x8x32xf32, #tpu.memory_space<vmem>>, vector<1x8x32xf32>
    %26 = arith.truncf %25 : vector<1x8x32xf32> to vector<1x8x32xbf16>
    "tpu.trace_start"() <{level = 10 : i32, message = "bqk,bkd->bqd"}> : () -> ()
    %cst_19 = arith.constant dense<0.000000e+00> : vector<1x8x32xf32>
    %27 = tpu.matmul %24, %26, %cst_19 {dimension_numbers = #tpu.dot_dimension_numbers<[2], [1], [1], [2], [0, 0, 0, 1, 1, 2], [0], [0]>} : vector<1x8x8xbf16>, vector<1x8x32xbf16>, vector<1x8x32xf32> -> vector<1x8x32xf32>
    "tpu.trace_stop"() : () -> ()
    %28 = vector.broadcast %20 : vector<1x8x1xf32> to vector<1x8x32xf32>
    %29 = arith.mulf %27, %28 : vector<1x8x32xf32>
    %c0_20 = arith.constant 0 : index
    %c0_21 = arith.constant 0 : index
    %c0_22 = arith.constant 0 : index
    %30 = vector.load %arg6[%c0_20, %c0_21, %c0_22] : memref<1x8x32xf32, #tpu.memory_space<vmem>>, vector<1x8x32xf32>
    tpu.vector_store %arg6[%c0_20, %c0_21, %c0_22], %29 {strides = array<i32>} : memref<1x8x32xf32, #tpu.memory_space<vmem>>, vector<1x8x32xf32>,
    return
  }
  func.func @transform_0(%arg0: i32, %arg1: i32) -> (i32, i32, i32) {
    %c0_i32 = arith.constant 0 : i32
    %c0_i32_0 = arith.constant 0 : i32
    return %arg0, %arg1, %c0_i32 : i32, i32, i32
  }
  func.func @transform_1(%arg0: i32, %arg1: i32) -> (i32, i32, i32) {
    %c0_i32 = arith.constant 0 : i32
    %c0_i32_0 = arith.constant 0 : i32
    %c0_i32_1 = arith.constant 0 : i32
    return %arg0, %c0_i32, %c0_i32_0 : i32, i32, i32
  }
  func.func @transform_2(%arg0: i32, %arg1: i32) -> (i32, i32, i32) {
    %c0_i32 = arith.constant 0 : i32
    %c0_i32_0 = arith.constant 0 : i32
    %c0_i32_1 = arith.constant 0 : i32
    return %arg0, %c0_i32, %c0_i32_0 : i32, i32, i32
  }
  func.func @transform_3(%arg0: i32, %arg1: i32) -> (i32, i32, i32) {
    %c0_i32 = arith.constant 0 : i32
    %c0_i32_0 = arith.constant 0 : i32
    return %arg0, %arg1, %c0_i32 : i32, i32, i32
  }
  func.func @transform_4(%arg0: i32, %arg1: i32) -> (i32, i32, i32) {
    %c0_i32 = arith.constant 0 : i32
    %c0_i32_0 = arith.constant 0 : i32
    return %arg0, %arg1, %c0_i32 : i32, i32, i32
  }
  func.func @transform_5(%arg0: i32, %arg1: i32) -> (i32, i32, i32) {
    %c0_i32 = arith.constant 0 : i32
    %c0_i32_0 = arith.constant 0 : i32
    return %arg0, %arg1, %c0_i32 : i32, i32, i32
  }
}

</mosaic_0001>

<bundles_post_ra>
// kernel: tpu_custom_call.1
= control target key start
LH: loop header
LB: loop body
LE: loop exit
PB: predicated region body
PF: predicated region fallthrough
CT: control target
= control target key end

     0   :  { %s1307_s0 = inlined_call_operand.hbm [shape: f32[2,8,32], index: 0, kind: input, shape index: {}]   ;;  %s1308_s1 = inlined_call_operand.hbm [shape: f32[2,8,32], index: 1, kind: input, shape index: {}]   ;;  %s1309_s2 = inlined_call_operand.hbm [shape: f32[2,8,32], index: 2, kind: input, shape index: {}]   ;;  %s1310_s3 = inlined_call_operand.vmem [shape: s8[2,8,8], index: 3, kind: input, shape index: {}]   ;;  %s1311_s4 = inlined_call_operand.hbm [shape: f32[2,8,32], index: 4, kind: output, shape index: {0}]   ;;  %s1312_s5 = inlined_call_operand.hbm [shape: f32[2,8,8], index: 5, kind: output, shape index: {1}]  }
   0x1   :  { %1318 = sst [smem:[#allocation19_spill]] %s1308_s1 }
   0x2   :  { %11 = vsyncpa [#allocation3], 0 }
   0x3   :  { %13 = vsyncpa [#allocation3 + $0x1], 0 }
   0x4   :  { %14 = vsyncpa [#allocation6], 0 }
   0x5   :  { %16 = vsyncpa [#allocation6 + $0x1], 0 }
   0x6   :  { %17 = vsyncpa [#allocation4], 0 }
   0x7   :  { %19 = vsyncpa [#allocation4 + $0x1], 0 }
   0x8   :  { %20 = vsyncpa [#allocation10], 0 }
   0x9   :  { %22 = vsyncpa [#allocation10 + $0x1], 0  ;;  %s1064_s18 = smov 0   ;;  %s1066_s19 = smov 0  }
   0xa   :  { %s1068_s20 = smov 0   ;;  %s1070_s21 = smov 0  }
   0xb   :  { %s1072_s22 = smov 0   ;;  %s1074_s23 = smov 0  }
   0xc LB: > { %1319 = sst [smem:[#allocation15_spill]] %s1020_s22  ;;  %s1095_s24 = sadd.s32 4294967295, %s1024_s23   ;;  %s1024_s23 = sphi %s1074_s23, %s28_s23   ;;  %s1020_s22 = sphi %s1072_s22, %s1335_s22   ;;  %s1016_s21 = sphi %s1070_s21, %s1334_s21   ;;  %s1012_s20 = sphi %s1068_s20, %s1338_s20   ;;  %s1008_s19 = sphi %s1066_s19, %s1337_s19   ;;  %s1004_s18 = sphi %s1064_s18, %s1336_s18  }
   0xd   : > { %1320 = sst [smem:[#allocation16_spill]] %s1024_s23  ;;  %s702_s25 = sadd.s32 4294967294, %s1024_s23  }
   0xe   : > { %s40_s26 = sadd.s32 1, %s1020_s22  ;;  %s49_s27 = sadd.s32 1, %s1012_s20 }
   0xf   : > { %p42_p0 = scmp.ge.s32.totalorder %s40_s26, 2  ;;  %p56_p1 = scmp.ne.s32.totalorder %s1012_s20, %s1008_s19 }
  0x10   : > { %p57_p2 = scmp.eq.s32.totalorder %s1024_s23, 0  ;;  %p62_p3 = scmp.ne.s32.totalorder %s1008_s19, %s1004_s18 }
  0x11   : > { %s1340_s26 = smov (%p42_p0, %s40_s26), 0  ;;  %p63_p5 = scmp.eq.s32.totalorder %s1095_s24, 0 }
  0x12   : > { %1321 = sst [smem:[#allocation17_spill]] %s1340_s26  ;;  %p1107_p4 = por %p57_p2, %p56_p1 }
  0x13   : > { %s44_s29 = ssub.s32 %s1020_s22, %s1340_s26  ;;  %p168_p6 = scmp.eq.s32.totalorder %s1095_s24, 1 }
  0x14   : > { %p47_p7 = scmp.eq.s32.totalorder %s44_s29, 0  ;;  %p1115_p8 = por %p63_p5, %p62_p3 }
  0x15   : > { %p1119_p9 = por %p168_p6, %p56_p1  ;;  %p174_p10 = scmp.eq.s32.totalorder %s702_s25, 1 }
  0x16   : > { %s1124_s7 = scalar_select %p47_p7, %s1012_s20, %s49_s27  }
  0x17   : > { %p1126_p11 = por %p174_p10, %p62_p3  ;;  %p769_p13 = scmp.lt.s32.totalorder %s1024_s23, 2 }
  0x18   : > { %1325 = sst [smem:[#allocation18_spill]] %s1124_s7  ;;  %s1313_s9 = sand.u32 1, %s1012_s20  }
  0x19   : > { %s1135_s10 = sshll.u32 %s1313_s9, 3  ;;  %s1138_s11 = sshll.u32 %s1020_s22, 7 }
  0x1a   : > { %p1142_p0 = pnand %p769_p13, %p1107_p4  ;;  %s241_s13 = sand.u32 1, %s1024_s23  }
  0x1b   : > { %s1328_s1 = sld [smem:[#allocation19_spill]]  ;;  %s245_s17 = scalar_lea.vmem [#allocation5], %s1135_s10 }
  0x1c   : > { %s252_s25 = sshll.u32 %s245_s17, 4  ;;  %p711_p1 = scmp.ge.s32.totalorder %s1024_s23, 1  ;;  %s253_s25 = int_to_ptr.vmem [resolvable:$true] %s252_s25 }
  0x1d   : > { %p285_p2 = scmp.lt.s32.totalorder %s1024_s23, 3  ;;  %s1154_s27 = scalar_lea.sflag [#allocation6], %s241_s13 }
  0x1e   : > { %p828_p3 = pneg %p1142_p0  ;;  %s839_s28 = scalar_lea.vmem %s253_s25, 128 }
  0x1f   : > { %p840_p4 = scmp.ne.s32.totalorder %s253_s25, %s839_s28  ;;  %s1026_s29 = smov [#allocation5]  }
  0x20   : > { %s844_s9 = sshll.u32 %s1026_s29, 4  ;;  %s845_s9 = int_to_ptr.vmem [resolvable:$false] %s844_s9 }
  0x21   : > { %s250_s16 = scalar_lea.hbm %s1328_s1, %s1138_s11  ;;  %p842_p5 = pnand %p840_p4, %p828_p3 }
  0x22   : > { %s846_s14 = scalar_lea.vmem %s845_s9, 256  ;;  %p847_p7 = scmp.lt.s32.totalorder %s253_s25, %s845_s9 }
  0x23   : > { %p843_p6 = pneg %p842_p5  ;;  %p848_p10 = scmp.lt.s32.totalorder %s846_s14, %s839_s28 }
  0x25   : > { %p849_p13 = por %p848_p10, %p847_p7 }
  0x27   : > { %p850_p12 = pnand %p849_p13, %p843_p6 }
  0x29   : > { %853 = shalt.err (!%p850_p12)
}
  0x2a   : > { %758 = dma.hbm_to_vmem [thread:$0]  (!%p1142_p0), %s250_s16, 128, %s253_s25, %s1154_s27  }
  0x2b   : > { %p1168_p4 = pnand %p711_p1, %p285_p2  ;;  %s232_s17 = scalar_lea.hbm %s1307_s0, %s1138_s11 }
  0x2c   : > { %s226_s28 = scalar_lea.vmem [#allocation2], %s1135_s10  ;;  %s268_s26 = scalar_lea.hbm %s1309_s2, %s1138_s11 }
  0x2d   : > { %s234_s29 = sshll.u32 %s226_s28, 4  ;;  %s1330_s22 = sand.u32 1, %s1012_s20   ;;  %s235_s29 = int_to_ptr.vmem [resolvable:$true] %s234_s29 }
  0x2e   : > { %s223_s7 = scalar_lea.sflag [#allocation3], %s1330_s22  ;;  %s867_s16 = scalar_lea.vmem %s235_s29, 128 }
  0x2f   : > { %p868_p12 = scmp.ne.s32.totalorder %s235_s29, %s867_s16  ;;  %s1027_s25 = smov [#allocation2]  }
  0x30   : > { %s872_s23 = sshll.u32 %s1027_s25, 4  ;;  %s873_s23 = int_to_ptr.vmem [resolvable:$false] %s872_s23 }
  0x31   : > { %p870_p1 = pnand %p868_p12, %p828_p3  ;;  %s874_s9 = scalar_lea.vmem %s873_s23, 256 }
  0x32   : > { %p875_p5 = scmp.lt.s32.totalorder %s235_s29, %s873_s23  ;;  %p876_p6 = scmp.lt.s32.totalorder %s874_s9, %s867_s16 }
  0x33   : > { %p871_p2 = pneg %p870_p1 }
  0x34   : > { %p877_p7 = por %p876_p6, %p875_p5 }
  0x36   : > { %p878_p10 = pnand %p877_p7, %p871_p2 }
  0x38   : > { %881 = shalt.err (!%p878_p10)
}
  0x39   : > { %755 = dma.hbm_to_vmem [thread:$0]  (!%p1142_p0), %s232_s17, 128, %s235_s29, %s223_s7  }
  0x3a   : > { %s263_s1 = scalar_lea.vmem [#allocation7], %s1135_s10  ;;  %s1028_s28 = smov [#allocation7]  }
  0x3b   : > { %s270_s22 = sshll.u32 %s263_s1, 4  ;;  %s900_s23 = sshll.u32 %s1028_s28, 4  ;;  %s271_s22 = int_to_ptr.vmem [resolvable:$true] %s270_s22  ;;  %s901_s23 = int_to_ptr.vmem [resolvable:$false] %s900_s23 }
  0x3c   : > { %s895_s15 = scalar_lea.vmem %s271_s22, 128  ;;  %s902_s14 = scalar_lea.vmem %s901_s23, 256 }
  0x3d   : > { %p896_p13 = scmp.ne.s32.totalorder %s271_s22, %s895_s15  ;;  %p903_p2 = scmp.lt.s32.totalorder %s271_s22, %s901_s23 }
  0x3e   : > { %p904_p5 = scmp.lt.s32.totalorder %s902_s14, %s895_s15 }
  0x3f   : > { %p898_p12 = pnand %p896_p13, %p828_p3 }
  0x40   : > { %p905_p6 = por %p904_p5, %p903_p2 }
  0x41   : > { %p899_p1 = pneg %p898_p12 }
  0x43   : > { %p906_p7 = pnand %p905_p6, %p899_p1 }
  0x45   : > { %909 = shalt.err (!%p906_p7)
}
  0x46   : > { %761 = dma.hbm_to_vmem [thread:$0]  (!%p1142_p0), %s268_s26, 128, %s271_s22, %s1154_s27  }
  0x47   : > { %289 = sbr.rel (%p1168_p4) target bundleno = 653 (0x28d), region = 36  ;;  %s1203_s17 = sand.u32 (!%p1168_p4), 1, %s1008_s19  }
  0x48   : > { %s1206_s29 = sshll.u32 (!%p1168_p4), %s1203_s17, 3  ;;  %s292_s12 = scalar_lea.sflag (!%p1168_p4), [#allocation3], %s1203_s17 }
  0x49   : > { %s295_s16 = scalar_lea.vmem (!%p1168_p4), [#allocation2], %s1206_s29 }
  0x4c   : > { %987 = dma.done.wait (%p1115_p8), %s292_s12, 128  }
  0x4d   : > { %989 = vsyncadd (%p1115_p8), %s292_s12, 4294967168  ;;  %s300_s26 = sand.u32 1, %s1095_s24   ;;  %s304_s27 = scalar_lea.vmem [#allocation5], %s1206_s29 }
  0x4e   : > { %s301_s11 = scalar_lea.sflag [#allocation6], %s300_s26 }
  0x4f   : > { %991 = dma.done.wait (%p1115_p8), %s301_s11, 256  }
  0x50   : > { %993 = vsyncadd (%p1115_p8), %s301_s11, 4294967040  ;;  %v1029_v0 = vmov 0.0   ;;  %vm1030_vm0 = vmmov 0   ;;  %v375_v1 = vld [vmem:[%s304_s27] sm:$0xff]  ;;  %vm377_vm1 = vcmask 261120   ;;  %v372_v2 = vld [vmem:[%s295_s16] sm:$0xff] }
  0x51   : > { %730 = vmatprep.subr.bf16.mxu0 %v1029_v0  ;;  %732 = vmatprep.mubr.msk.bf16.mxu0 %vm1030_vm0, %v1029_v0  ;;  %v376_v3 = vpack.c.bf16 %v375_v1, %v375_v1  ;;  %v373_v5 = vmul.f32 0.17677669, %v372_v2  ;;  %p362_p8 = scmp.lt.s32.totalorder %s1016_s21, 1  ;;  %v1031_v8 = vmov 0   ;;  %vm430_vm4 = vcmask 64512   ;;  %s313_s1 = scalar_lea.vmem [#allocation7], %s1206_s29 }
  0x52   : > { %736 = vmatprep.subr.bf16.mxu1 %v1029_v0  ;;  %738 = vmatprep.mubr.msk.bf16.mxu1 %vm1030_vm0, %v1029_v0  ;;  %v445_v17 = vld [vmem:[%s313_s1] sm:$0xff]  ;;  %vm450_vm5 = vcmask 1043456   ;;  %s722_s22 = sshll.u32 %s1016_s21, 7  ;;  %s361_s15 = scalar_lea.vmem [#allocation9], %s1206_s29 }
  0x53   : > { %v382_v4 = vsel %vm377_vm1, %v376_v3, 0  ;;  %v374_v6 = vpack.c.bf16 %v373_v5, %v373_v5  ;;  %s363_s24 = scalar_select %p362_p8, %s1016_s21, 1  ;;  %v446_v18 = vpack.c.bf16 %v445_v17, %v445_v17 }
  0x54   : > { %731 = vmatpush3.bf16.xpose.msra.mxu0 %v382_v4  ;;  %s530_s28 = sshll.u32 %s361_s15, 4  ;;  %s528_s7 = scalar_lea.hbm %s1312_s5, %s722_s22  ;;  %s531_s28 = int_to_ptr.vmem [resolvable:$true] %s530_s28 }
  0x55   : > { %s717_s30 = sshll.u32 %s363_s24, 1  ;;  %v452_v19 = vsel %vm450_vm5, %v446_v18, 0  ;;  %s502_s10 = scalar_lea.sflag [#allocation10], %s1203_s17 }
  0x56   : > { %s368_s9 = scalar_lea.vmem %s1310_s3, %s717_s30  ;;  %737 = vmatpush3.bf16.msra.mxu1 %v452_v19  ;;  %s910_s12 = scalar_lea.vmem %s531_s28, 128 }
  0x57   : > { %v424_v7 = vld [vmem:[%s368_s9] sm:$0x3]  ;;  %p911_p0 = scmp.ne.s32.totalorder %s531_s28, %s910_s12  ;;  %s1032_s16 = smov [#allocation9]  }
  0x58   : > { %vm425_vm2 = vnez %v424_v7  ;;  %s914_s26 = sshll.u32 %s1032_s16, 4  ;;  %s915_s26 = int_to_ptr.vmem [resolvable:$false] %s914_s26 }
  0x59   : > { %v426_v9 = vsel %vm425_vm2, 16843009, %v1031_v8  ;;  %p912_p3 = pnand %p911_p0, %p1119_p9  ;;  %s916_s11 = scalar_lea.vmem %s915_s26, 256 }
  0x5a   : > { %v427_v10 = vunpack.c.0.s8 %v426_v9  ;;  %p917_p10 = scmp.lt.s32.totalorder %s531_s28, %s915_s26  ;;  %p918_p13 = scmp.lt.s32.totalorder %s916_s11, %s910_s12 }
  0x5b   : > { %733 = vmatmul.mubr.msk.bf16.vlgmr.msra.gmra.mxu0 %vm377_vm1, %v374_v6  ;;  %p913_p4 = pneg %p912_p3 }
  0x5c   : > { %vm428_vm3 = vcmp.ne.s32.totalorder %v427_v10, 0  ;;  %p919_p12 = por %p918_p13, %p917_p10 }
  0x5e   : > { %p920_p1 = pnand %p919_p12, %p913_p4 }
 0x11b   : > { %v418_v11 = vpop.f32.mrf.mxu0 }
 0x11c   : > { %v429_v12 = vsel %vm428_vm3, -1e+10, %v418_v11 }
 0x11d   : > { %v734_v13 = vpop.f32.mrf.mxu0  ;;  %v431_v14 = vsel %vm430_vm4, %v429_v12, -inf }
 0x11e   : > { %432 = vmax.xlane.f32.xlu0 %v431_v14 }
 0x11f   : > { %v421_v15 = vpop.f32.mrf.mxu0 }
 0x121   : > { %v735_v16 = vpop.f32.mrf.mxu0 }
 0x1a7   : > { %v433_v20 = vpop.xlane.xlu0 %432 }
 0x1a8   : > { %v434_v21 = vsub.f32 %v429_v12, %v433_v20 }
 0x1aa   : > { %v435_v22 = vmul.f32 1.442695, %v434_v21 }
 0x1ac   : > { %822 = vpow2.f32 %v435_v22 }
 0x1b9   : > { %v823_v23 = vpop.eup %822 }
 0x1ba   : > { %v437_v24 = vsel %vm430_vm4, %v823_v23, 0.0  ;;  %v444_v25 = vpack.c.bf16 %v823_v23, %v823_v23 }
 0x1bb   : > { %438 = vadd.xlane.f32.xlu0 %v437_v24 }
 0x1bc   : > { %739 = vmatmul.mubr.msk.bf16.vlgmr.msra.gmra.mxu1 %vm430_vm4, %v444_v25 }
 0x244   : > { %v439_v26 = vpop.xlane.xlu0 %438 }
 0x245   : > { %824 = vrcp.f32 %v439_v26 }
 0x252   : > { %v825_v27 = vpop.eup %824 }
 0x253   : > { %v442_v28 = vmul.f32 %v825_v27, %v823_v23 }
 0x255   : > { %443 = vst.msk [vmem:[%s361_s15] sm:$0xff] %vm430_vm4, %v442_v28 }
 0x256   : > { %923 = shalt.err (!%p920_p1)
}
 0x257   : > { %s924_s27 = scalar_lea.hbm %s528_s7, 128  ;;  %s928_s13 = scalar_lea.hbm %s1312_s5, 256 }
 0x258   : > { %p925_p2 = scmp.ne.s32.totalorder %s528_s7, %s924_s27  ;;  %p929_p7 = scmp.lt.s32.totalorder %s528_s7, %s1312_s5 }
 0x259   : > { %p930_p8 = scmp.lt.s32.totalorder %s928_s13, %s924_s27 }
 0x25a   : > { %p926_p5 = pnand %p925_p2, %p1119_p9 }
 0x25b   : > { %p931_p0 = por %p930_p8, %p929_p7 }
 0x25c   : > { %p927_p6 = pneg %p926_p5 }
 0x25e   : > { %p932_p3 = pnand %p931_p0, %p927_p6 }
 0x260   : > { %935 = shalt.err (!%p932_p3)
}
 0x261   : > { %749 = dma.vmem_to_hbm [thread:$0]  (%p1119_p9), %s531_s28, 128, %s528_s7, %s502_s10  }
 0x262   : > { %s354_s1 = scalar_lea.vmem [#allocation8], %s1206_s29  ;;  %s1258_s12 = scalar_lea.hbm %s1311_s4, %s722_s22 }
 0x263   : > { %s516_s15 = sshll.u32 %s354_s1, 4  ;;  %s497_s28 = scalar_lea.sflag [#allocation4], %s1203_s17  ;;  %s1260_s15 = int_to_ptr.vmem [resolvable:$true] %s516_s15 }
 0x264   : > { %s936_s29 = scalar_lea.vmem %s1260_s15, 128  ;;  %s1033_s21 = smov [#allocation8]  }
 0x265   : > { %p937_p4 = scmp.ne.s32.totalorder %s1260_s15, %s936_s29  ;;  %s940_s7 = sshll.u32 %s1033_s21, 4  ;;  %s941_s7 = int_to_ptr.vmem [resolvable:$false] %s940_s7 }
 0x266   : > { %s942_s22 = scalar_lea.vmem %s941_s7, 256  ;;  %p943_p12 = scmp.lt.s32.totalorder %s1260_s15, %s941_s7 }
 0x267   : > { %p938_p10 = pnand %p937_p4, %p1119_p9  ;;  %p944_p1 = scmp.lt.s32.totalorder %s942_s22, %s936_s29 }
 0x269   : > { %p939_p13 = pneg %p938_p10  ;;  %p945_p2 = por %p944_p1, %p943_p12 }
 0x26b   : > { %p946_p5 = pnand %p945_p2, %p939_p13 }
 0x27c   : > { %v488_v29 = vpop.f32.mrf.mxu1 }
 0x27d   : > { %v494_v30 = vmul.f32 %v825_v27, %v488_v29 }
 0x27e   : > { %v740_v31 = vpop.f32.mrf.mxu1 }
 0x27f   : > { %495 = vst.msk [vmem:[%s354_s1] sm:$0xff] %vm377_vm1, %v494_v30 }
 0x280   : > { %v491_v32 = vpop.f32.mrf.mxu1 }
 0x281   : > { %949 = shalt.err (!%p946_p5)
}
 0x282   : > { %s950_s10 = scalar_lea.hbm %s1258_s12, 128  ;;  %s954_s26 = scalar_lea.hbm %s1311_s4, 256 }
 0x283   : > { %p951_p6 = scmp.ne.s32.totalorder %s1258_s12, %s950_s10  ;;  %p955_p0 = scmp.lt.s32.totalorder %s1258_s12, %s1311_s4 }
 0x284   : > { %p956_p3 = scmp.lt.s32.totalorder %s954_s26, %s950_s10 }
 0x285   : > { %p952_p7 = pnand %p951_p6, %p1119_p9 }
 0x286   : > { %p957_p4 = por %p956_p3, %p955_p0 }
 0x287   : > { %p953_p8 = pneg %p952_p7 }
 0x289   : > { %p958_p10 = pnand %p957_p4, %p953_p8 }
 0x28b   : > { %961 = shalt.err (!%p958_p10)
}
 0x28c   : > { %748 = dma.vmem_to_hbm [thread:$0]  (%p1119_p9), %s1260_s15, 128, %s1258_s12, %s497_s28   ;;  %v741_v33 = vpop.f32.mrf.mxu1 }
 0x28d PF: > { %s1331_s24 = sld [smem:[#allocation16_spill]]  ;;  %s542_s30 = sand.u32 1, %s1004_s18  }
 0x28e   : > { %s543_s13 = scalar_lea.sflag [#allocation4], %s542_s30 }
 0x293   : > { %p1332_p13 = scmp.ge.s32.totalorder %s1331_s24, 2 }
 0x295   : > { %p763_p12 = pnand %p1332_p13, %p1126_p11 }
 0x297   : > { %p764_p1 = pneg %p763_p12 }
 0x299   : > { %995 = dma.done.wait (%p764_p1), %s543_s13, 128  }
 0x29a   : > { %997 = vsyncadd (%p764_p1), %s543_s13, 4294967168  ;;  %s552_s25 = scalar_lea.sflag [#allocation10], %s542_s30 }
 0x29b   : > { %999 = dma.done.wait (%p764_p1), %s552_s25, 128  }
 0x29c   : > { %1001 = vsyncadd (%p764_p1), %s552_s25, 4294967168  ;;  %s28_s23 = sadd.s32 1, %s1331_s24   ;;  %s1333_s6 = sld [smem:[#allocation18_spill]] }
 0x29d   : > { %p25_p2 = scmp.ge.s32.totalorder %s28_s23, 4   ;;  %s1334_s21 = sld [smem:[#allocation15_spill]] }
 0x29e   : > { %s1335_s22 = sld [smem:[#allocation17_spill]]  ;;  %s1336_s18 = smov %s1008_s19 }
 0x29f   : > { %s1337_s19 = smov %s1012_s20  ;;  %27 = sbr.rel (!%p25_p2) target bundleno = 12 (0xc), region = 125 }
 0x2a2   : > { %s1338_s20 = smov %s1333_s6 }
 0x2a4   :  { %557 = vsyncpa [#allocation3], 1 }
 0x2a5   :  { %559 = vsyncpa [#allocation3 + $0x1], 1 }
 0x2a6   :  { %560 = vsyncpa [#allocation6], 1 }
 0x2a7   :  { %562 = vsyncpa [#allocation6 + $0x1], 1 }
 0x2a8   :  { %563 = vsyncpa [#allocation4], 1 }
 0x2a9   :  { %565 = vsyncpa [#allocation4 + $0x1], 1 }
 0x2aa   :  { %566 = vsyncpa [#allocation10], 1 }
 0x2ab   :  { %568 = vsyncpa [#allocation10 + $0x1], 1 }

</bundles_post_ra>
